<compile_context>
chip_gen: v7x
topology: tpu7x:2x2x1
jax: 0.10.0
libtpu: 0.0.40
codegen_flags: <defaults>
</compile_context>

<pallas_src>
import functools
import math

import numpy as np
import jax
import jax.numpy as jnp
from jax.experimental import pallas as pl
from jax.experimental.pallas import tpu as pltpu

_VMEM_LIMIT = 48 * 1024 * 1024  # explicit scoped-VMEM budget (safe on v5e/v6e/v7x)


# -----------------------------------------------------------------------------
# In-kernel math helpers (all f32)
# -----------------------------------------------------------------------------
def _gelu_exact(x):
    # PyTorch nn.GELU() / F.gelu default: exact erf formulation.
    return 0.5 * x * (1.0 + jax.lax.erf(x * (1.0 / math.sqrt(2.0))))


def _softmax_last(s):
    m = jnp.max(s, axis=-1, keepdims=True)
    e = jnp.exp(s - m)
    return e * pl.reciprocal(jnp.sum(e, axis=-1, keepdims=True))


def _layernorm(x, g, b):
    mu = jnp.mean(x, axis=-1, keepdims=True)
    xc = x - mu
    var = jnp.mean(xc * xc, axis=-1, keepdims=True)
    return xc * jax.lax.rsqrt(var + 1e-5) * g + b


def _bf16(x):
    return x.astype(jnp.bfloat16)


def _pick_batch_tile(bs, n, target_rows=256):
    """Largest divisor of bs whose folded M (= bt*n) stays near the MXU sweet spot."""
    best = 1
    for cand in range(1, bs + 1):
        if bs % cand == 0 and cand * n <= max(target_rows, n):
            best = cand
    return best


# -----------------------------------------------------------------------------
# Kernel 1: input Linear + GELU with the cls-token prepend fused in.
# Processes a (bt, T, Din) block per grid step, writes (bt, T+1, E).
# -----------------------------------------------------------------------------
def _input_fc_kernel(x_ref, cls_ref, w_ref, b_ref, o_ref):
    bt, t, din = x_ref.shape
    e = w_ref.shape[1]
    w = w_ref[...]                                             # (Din, E) bf16
    b = b_ref[...]                                             # (1, E)   f32

    # cls token (shared across batch) through the same Linear+GELU.
    y_cls = _gelu_exact(
        jnp.dot(_bf16(cls_ref[...]), w, preferred_element_type=jnp.float32) + b)

    x = x_ref[...].reshape(bt * t, din)                        # fold batch into M
    y = _gelu_exact(
        jnp.dot(_bf16(x), w, preferred_element_type=jnp.float32) + b)

    full = jnp.concatenate(
        [jnp.broadcast_to(y_cls.reshape(1, 1, e), (bt, 1, e)),
         y.reshape(bt, t, e)], axis=1)                         # (bt, T+1, E)
    o_ref[...] = full.astype(o_ref.dtype)


def input_fc(feats, cls_tok, w, b, *, bt):
    bs, t, din = feats.shape
    e = w.shape[1]
    n = t + 1
    const = functools.partial(pl.BlockSpec, pipeline_mode=pl.Buffered(1))
    return pl.pallas_call(
        _input_fc_kernel,
        out_shape=jax.ShapeDtypeStruct((bs, n, e), jnp.float32),
        grid=(bs // bt,),
        in_specs=[
            pl.BlockSpec((bt, t, din), lambda i: (i, 0, 0)),   # feats
            const((1, e), lambda i: (0, 0)),                   # cls token (raw)
            const((din, e), lambda i: (0, 0)),                 # input_fc weight (bf16)
            const((1, e), lambda i: (0, 0)),                   # input_fc bias
        ],
        out_specs=pl.BlockSpec((bt, n, e), lambda i: (i, 0, 0)),
        compiler_params=pltpu.CompilerParams(
            dimension_semantics=("parallel",),
            vmem_limit_bytes=_VMEM_LIMIT),
    )(feats, cls_tok, w, b)


# -----------------------------------------------------------------------------
# Kernel 2: ALL transformer layers in one launch.
# grid = (batch_tiles, depth); depth axis "arbitrary"; hidden state resident
# in the output block across depth.  Per-layer weights stacked on depth axis.
# -----------------------------------------------------------------------------
def _layers_kernel(lam_full_ref, lam_init_ref, h_ref,
                   ln_g_ref, ln_b_ref, qkv_w_ref, o_w_ref, subln_g_ref,
                   o_ref, *, num_heads, head_dim, scaling):
    l = pl.program_id(1)

    @pl.when(l == 0)
    def _():
        o_ref[...] = h_ref[...]                                # seed residual stream

    h = o_ref[...]                                             # (bt, N, E) f32, resident
    bt, n, e = h.shape
    m = bt * n
    h2 = h.reshape(m, e)

    x = _layernorm(h2, ln_g_ref[0], ln_b_ref[0])               # f32

    # Fused Q/K/V projection: one (M, E) x (E, 3E) bf16 matmul, f32 accumulate.
    qkv = jnp.dot(_bf16(x), qkv_w_ref[0], preferred_element_type=jnp.float32)
    q = qkv[:, :e].reshape(bt, n, e)
    k = qkv[:, e:2 * e].reshape(bt, n, e)
    v = qkv[:, 2 * e:].reshape(bt, n, e)

    lam_full = lam_full_ref[l]                                 # SMEM scalar, f32
    lam_init = lam_init_ref[l]

    d = head_dim
    td = 2 * d
    subg = subln_g_ref[0]                                      # (1, 2d) f32

    # Per-head diff attention; out-proj accumulated per head (no lane concat).
    out = jnp.zeros((m, e), jnp.float32)
    for hd in range(num_heads):                                # static unroll
        base = hd * td
        q1 = _bf16(q[:, :, base:base + d] * scaling)
        q2 = _bf16(q[:, :, base + d:base + td] * scaling)
        k1 = _bf16(k[:, :, base:base + d])
        k2 = _bf16(k[:, :, base + d:base + td])
        vh = _bf16(v[:, :, base:base + td])
        s1 = jnp.einsum('bqd,bkd->bqk', q1, k1, preferred_element_type=jnp.float32)
        s2 = jnp.einsum('bqd,bkd->bqk', q2, k2, preferred_element_type=jnp.float32)
        attn = _softmax_last(s1) - lam_full * _softmax_last(s2)
        oh = jnp.einsum('bqk,bkd->bqd', _bf16(attn), vh,
                        preferred_element_type=jnp.float32)    # (bt, N, 2d)
        # subln: RMSNorm(2*head_dim, eps=1e-5) with weight gamma.
        ms = jnp.mean(oh * oh, axis=-1, keepdims=True)
        oh = oh * jax.lax.rsqrt(ms + 1e-5) * subg
        oh = (oh * (1.0 - lam_init)).reshape(m, td)
        # Sublane-aligned row slice of the out-proj weight, accumulate via MXU.
        out = out + jnp.dot(_bf16(oh), o_w_ref[0, base:base + td, :],
                            preferred_element_type=jnp.float32)

    o_ref[...] = (h2 + out).reshape(bt, n, e).astype(o_ref.dtype)  # residual, dropout p=0


def layers_block(h, p, *, num_heads, head_dim, bt):
    bs, n, e = h.shape
    depth = p["qkv_w"].shape[0]
    smem = pl.BlockSpec(memory_space=pltpu.MemorySpace.SMEM)
    return pl.pallas_call(
        functools.partial(_layers_kernel, num_heads=num_heads, head_dim=head_dim,
                          scaling=head_dim ** -0.5),
        out_shape=jax.ShapeDtypeStruct((bs, n, e), h.dtype),
        grid=(bs // bt, depth),
        in_specs=[
            smem,                                              # lambda_full (depth,)
            smem,                                              # lambda_init (depth,)
            pl.BlockSpec((bt, n, e), lambda i, l: (i, 0, 0)),  # h (read once per i)
            pl.BlockSpec((1, 1, e), lambda i, l: (l, 0, 0)),   # ln gamma
            pl.BlockSpec((1, 1, e), lambda i, l: (l, 0, 0)),   # ln beta
            pl.BlockSpec((1, e, 3 * e), lambda i, l: (l, 0, 0)),  # fused qkv (bf16)
            pl.BlockSpec((1, e, e), lambda i, l: (l, 0, 0)),      # out proj (bf16)
            pl.BlockSpec((1, 1, 2 * head_dim), lambda i, l: (l, 0, 0)),  # subln gamma
        ],
        out_specs=pl.BlockSpec((bt, n, e), lambda i, l: (i, 0, 0)),
        compiler_params=pltpu.CompilerParams(
            dimension_semantics=("parallel", "arbitrary"),
            vmem_limit_bytes=_VMEM_LIMIT),
    )(p["lambda_full"], p["lambda_init"], h,
      p["ln_g"], p["ln_b"], p["qkv_w"], p["o_w"], p["subln_g"])


# -----------------------------------------------------------------------------
# Kernel 3: tail -- cross attention (heads=1) + out proj + residual,
#           FF (GEGLU) + residual, padded lane-dense logits.
# -----------------------------------------------------------------------------
def _tail_kernel(cls_ref, h_ref,
                 can_g, can_b, cac_g, cac_b, kv_w, out_w, out_b,
                 ffn_g, ffn_b, ff_w1, ff_b1, ff_w2, ff_b2, lg_w, lg_b,
                 o_ref, *, scale):
    bt, n, e = h_ref.shape
    cls = cls_ref[...]                                         # (1, E) raw cls token
    h2 = h_ref[...].reshape(bt * n, e)

    # PreNorm: query = raw cls token, context = encoded sequence.
    q = _layernorm(cls, can_g[...], can_b[...])                # (1, E)
    ctx = _layernorm(h2, cac_g[...], cac_b[...])               # (bt*N, E)

    # to_kv (no bias), chunk into k, v.
    kv = jnp.dot(_bf16(ctx), kv_w[...], preferred_element_type=jnp.float32)
    k = kv[:, :e].reshape(bt, n, e)
    v = kv[:, e:].reshape(bt, n, e)

    qb = _bf16(jnp.broadcast_to(q.reshape(1, 1, e), (bt, 1, e)))
    sim = jnp.einsum('bqd,bkd->bqk', qb, _bf16(k),
                     preferred_element_type=jnp.float32) * scale   # (bt, 1, N)
    attn = _softmax_last(sim)
    ao = jnp.einsum('bqk,bkd->bqd', _bf16(attn), _bf16(v),
                    preferred_element_type=jnp.float32).reshape(bt, e)

    # to_out (with bias) + residual with the raw cls token.
    x = jnp.dot(_bf16(ao), out_w[...], preferred_element_type=jnp.float32) + out_b[...]
    x = x + cls

    # cross feed-forward: PreNorm -> Linear -> GEGLU -> Linear, residual.
    xn = _layernorm(x, ffn_g[...], ffn_b[...])
    yy = jnp.dot(_bf16(xn), ff_w1[...], preferred_element_type=jnp.float32) + ff_b1[...]
    ff = yy[:, :e] * _gelu_exact(yy[:, e:])                    # GEGLU (value * gelu(gate))
    ff = jnp.dot(_bf16(ff), ff_w2[...], preferred_element_type=jnp.float32) + ff_b2[...]
    x = x + ff

    # to_logits -- padded to a lane-dense 128-wide slab.
    logits = jnp.dot(_bf16(x), lg_w[...], preferred_element_type=jnp.float32) + lg_b[...]
    o_ref[...] = logits[:, None, :].astype(o_ref.dtype)


def tail_block(cls_tok, h, p, *, bt):
    bs, n, e = h.shape
    cpad = p["logit_w"].shape[1]

    def rep(shape):
        nd = len(shape)
        return pl.BlockSpec(shape, lambda i, _nd=nd: (0,) * _nd,
                            pipeline_mode=pl.Buffered(1))      # single-buffer constants

    return pl.pallas_call(
        functools.partial(_tail_kernel, scale=e ** -0.5),
        out_shape=jax.ShapeDtypeStruct((bs, 1, cpad), jnp.float32),
        grid=(bs // bt,),
        in_specs=[
            rep((1, e)),                                       # raw cls token
            pl.BlockSpec((bt, n, e), lambda i: (i, 0, 0)),     # encoded sequence
            rep((1, e)), rep((1, e)),                          # ca_norm g/b
            rep((1, e)), rep((1, e)),                          # ca context norm g/b
            rep((e, 2 * e)),                                   # to_kv (bf16, no bias)
            rep((e, e)), rep((1, e)),                          # to_out w(bf16)/b
            rep((1, e)), rep((1, e)),                          # ff norm g/b
            rep((e, 2 * e)), rep((1, 2 * e)),                  # ff w1(bf16)/b1
            rep((e, e)), rep((1, e)),                          # ff w2(bf16)/b2
            rep((e, cpad)), rep((1, cpad)),                    # logits w(bf16)/b (padded)
        ],
        out_specs=pl.BlockSpec((bt, 1, cpad), lambda i: (i, 0, 0)),
        compiler_params=pltpu.CompilerParams(
            dimension_semantics=("parallel",),
            vmem_limit_bytes=_VMEM_LIMIT),
    )(cls_tok, h,
      p["ca_norm_g"], p["ca_norm_b"], p["ca_ctx_g"], p["ca_ctx_b"],
      p["ca_kv_w"], p["ca_out_w"], p["ca_out_b"],
      p["ff_norm_g"], p["ff_norm_b"], p["ff_w1"], p["ff_b1"],
      p["ff_w2"], p["ff_b2"], p["logit_w"], p["logit_b"])


# -----------------------------------------------------------------------------
# Parameters (deterministic, in-script).  Matmul weights stored bf16,
# LayerNorm / bias / scalar parameters kept f32.
# -----------------------------------------------------------------------------
def init_params(key, input_dim, embed_dim, depth, num_heads, num_class):
    assert input_dim == embed_dim, "NASCSingle forward assumes input_dim == embed_dim"
    keys = list(jax.random.split(key, 16 + 8 * depth))
    it = iter(keys)

    def dense(fan_in, fan_out):
        return jax.random.normal(next(it), (fan_in, fan_out), jnp.float32) * 0.02

    e = embed_dim
    head_dim = embed_dim // num_heads // 2
    p = {
        "cls_token": jax.random.normal(next(it), (1, e), jnp.float32),
        "input_fc_w": dense(input_dim, e).astype(jnp.bfloat16),
        "input_fc_b": jnp.zeros((1, e), jnp.float32),
    }

    qkv_ws, o_ws, lam_fulls, lam_inits = [], [], [], []
    for i in range(depth):
        lam_init = 0.8 - 0.6 * math.exp(-0.3 * (i + 1))        # lambda_init_fn(depth=i+1)
        lq1 = np.asarray(jax.random.normal(next(it), (head_dim,))) * 0.1
        lk1 = np.asarray(jax.random.normal(next(it), (head_dim,))) * 0.1
        lq2 = np.asarray(jax.random.normal(next(it), (head_dim,))) * 0.1
        lk2 = np.asarray(jax.random.normal(next(it), (head_dim,))) * 0.1
        lam_fulls.append(float(np.exp(np.sum(lq1 * lk1)) - np.exp(np.sum(lq2 * lk2)) + lam_init))
        lam_inits.append(lam_init)
        q_w = dense(e, e)
        k_w = dense(e, e)
        v_w = dense(e, e)
        qkv_ws.append(jnp.concatenate([q_w, k_w, v_w], axis=1))  # fused (E, 3E)
        o_ws.append(dense(e, e))

    p["qkv_w"] = jnp.stack(qkv_ws).astype(jnp.bfloat16)         # (depth, E, 3E)
    p["o_w"] = jnp.stack(o_ws).astype(jnp.bfloat16)             # (depth, E, E)
    p["ln_g"] = jnp.ones((depth, 1, e), jnp.float32)
    p["ln_b"] = jnp.zeros((depth, 1, e), jnp.float32)
    p["subln_g"] = jnp.ones((depth, 1, 2 * head_dim), jnp.float32)
    p["lambda_full"] = jnp.asarray(lam_fulls, jnp.float32)       # (depth,) SMEM scalars
    p["lambda_init"] = jnp.asarray(lam_inits, jnp.float32)

    # cross attention (PreNorm with context norm, Attention heads=1)
    p["ca_norm_g"] = jnp.ones((1, e), jnp.float32)
    p["ca_norm_b"] = jnp.zeros((1, e), jnp.float32)
    p["ca_ctx_g"] = jnp.ones((1, e), jnp.float32)
    p["ca_ctx_b"] = jnp.zeros((1, e), jnp.float32)
    p["ca_kv_w"] = dense(e, 2 * e).astype(jnp.bfloat16)          # to_kv, no bias
    p["ca_out_w"] = dense(e, e).astype(jnp.bfloat16)             # to_out, with bias
    p["ca_out_b"] = jnp.zeros((1, e), jnp.float32)

    # cross feed-forward (PreNorm + Linear -> GEGLU -> Linear)
    p["ff_norm_g"] = jnp.ones((1, e), jnp.float32)
    p["ff_norm_b"] = jnp.zeros((1, e), jnp.float32)
    p["ff_w1"] = dense(e, 2 * e).astype(jnp.bfloat16)
    p["ff_b1"] = jnp.zeros((1, 2 * e), jnp.float32)
    p["ff_w2"] = dense(e, e).astype(jnp.bfloat16)
    p["ff_b2"] = jnp.zeros((1, e), jnp.float32)

    # to_logits, padded to 128 output lanes (wrapper slices [:, :num_class]).
    cpad = ((num_class + 127) // 128) * 128
    lw = dense(e, num_class)
    logit_w = jnp.zeros((e, cpad), jnp.float32).at[:, :num_class].set(lw)
    p["logit_w"] = logit_w.astype(jnp.bfloat16)
    p["logit_b"] = jnp.zeros((1, cpad), jnp.float32)
    return p


# -----------------------------------------------------------------------------
# Forward pass: exactly 3 pallas_calls (input_fc, all layers, tail).
# -----------------------------------------------------------------------------
def nasc_forward(params, feats, *, num_heads, num_class):
    bs, t, din = feats.shape
    e = params["qkv_w"].shape[1]
    n = t + 1
    head_dim = e // num_heads // 2
    bt = _pick_batch_tile(bs, n)

    h = input_fc(feats, params["cls_token"], params["input_fc_w"],
                 params["input_fc_b"], bt=bt)                  # (bs, N, E)
    h = layers_block(h, params, num_heads=num_heads, head_dim=head_dim, bt=bt)
    logits = tail_block(params["cls_token"], h, params, bt=bt)  # (bs, 1, 128)
    return logits.reshape(bs, -1)[:, :num_class]


# -----------------------------------------------------------------------------
if __name__ == "__main__":
    INPUT_DIM = EMBED_DIM = 128
    NUM_CLASS = 3
    DEPTH = 2
    NUM_HEADS = 4
    BS, T = 2, 8

    key = jax.random.PRNGKey(0)
    pkey, xkey = jax.random.split(key)
    params = init_params(pkey, INPUT_DIM, EMBED_DIM, DEPTH, NUM_HEADS, NUM_CLASS)
    feats = jax.random.normal(xkey, (BS, T, INPUT_DIM), jnp.float32)

    logits = nasc_forward(params, feats, num_heads=NUM_HEADS, num_class=NUM_CLASS)
    logits = jax.block_until_ready(logits)
    assert logits.shape == (BS, NUM_CLASS)
    assert bool(jnp.all(jnp.isfinite(logits)))
    print("KERNEL_OK")
</pallas_src>

<mosaic_0001>
module attributes {stable_mosaic.version = 11 : i64} {
  func.func @_input_fc_kernel(%arg0: i32, %arg1: memref<2x8x128xf32, #tpu.memory_space<vmem>>, %arg2: memref<1x128xf32, #tpu.memory_space<vmem>>, %arg3: memref<128x128xbf16, #tpu.memory_space<vmem>>, %arg4: memref<1x128xf32, #tpu.memory_space<vmem>>, %arg5: memref<2x9x128xf32, #tpu.memory_space<vmem>>) attributes {dimension_semantics = [#tpu.dimension_semantics<parallel>], iteration_bounds = array<i64: 1>, scalar_prefetch = 0 : i64, scratch_operands = 0 : i64, tpu.core_type = #tpu.core_type<tc>, window_params = [{transform_indices = @transform_0, window_bounds = array<i64: 2, 8, 128>}, {pipeline_mode = #tpu.pipeline_mode<synchronous>, transform_indices = @transform_1, window_bounds = array<i64: 1, 128>}, {pipeline_mode = #tpu.pipeline_mode<synchronous>, transform_indices = @transform_2, window_bounds = array<i64: 128, 128>}, {pipeline_mode = #tpu.pipeline_mode<synchronous>, transform_indices = @transform_3, window_bounds = array<i64: 1, 128>}, {transform_indices = @transform_4, window_bounds = array<i64: 2, 9, 128>}]} {
    %c0 = arith.constant 0 : index
    %c0_0 = arith.constant 0 : index
    %0 = vector.load %arg3[%c0, %c0_0] : memref<128x128xbf16, #tpu.memory_space<vmem>>, vector<128x128xbf16>
    %c0_1 = arith.constant 0 : index
    %c0_2 = arith.constant 0 : index
    %1 = vector.load %arg4[%c0_1, %c0_2] : memref<1x128xf32, #tpu.memory_space<vmem>>, vector<1x128xf32>
    %c0_3 = arith.constant 0 : index
    %c0_4 = arith.constant 0 : index
    %2 = vector.load %arg2[%c0_3, %c0_4] : memref<1x128xf32, #tpu.memory_space<vmem>>, vector<1x128xf32>
    %3 = arith.truncf %2 : vector<1x128xf32> to vector<1x128xbf16>
    %cst = arith.constant dense<0.000000e+00> : vector<1x128xf32>
    %4 = tpu.matmul %3, %0, %cst {dimension_numbers = #tpu.dot_dimension_numbers<[1], [0], [0], [1], [0, 0, 1, 1], [], []>} : vector<1x128xbf16>, vector<128x128xbf16>, vector<1x128xf32> -> vector<1x128xf32>
    %5 = arith.addf %4, %1 : vector<1x128xf32>
    %cst_5 = arith.constant 5.000000e-01 : f32
    %6 = vector.broadcast %cst_5 : f32 to vector<1x128xf32>
    %7 = arith.mulf %6, %5 : vector<1x128xf32>
    %cst_6 = arith.constant 0.707106769 : f32
    %8 = vector.broadcast %cst_6 : f32 to vector<1x128xf32>
    %9 = arith.mulf %5, %8 : vector<1x128xf32>
    %10 = math.erf %9 : vector<1x128xf32>
    %cst_7 = arith.constant 1.000000e+00 : f32
    %11 = vector.broadcast %cst_7 : f32 to vector<1x128xf32>
    %12 = arith.addf %11, %10 : vector<1x128xf32>
    %13 = arith.mulf %7, %12 : vector<1x128xf32>
    %c0_8 = arith.constant 0 : index
    %c0_9 = arith.constant 0 : index
    %c0_10 = arith.constant 0 : index
    %14 = vector.load %arg1[%c0_8, %c0_9, %c0_10] : memref<2x8x128xf32, #tpu.memory_space<vmem>>, vector<2x8x128xf32>
    %15 = vector.shape_cast %14 : vector<2x8x128xf32> to vector<16x128xf32>
    %16 = arith.truncf %15 : vector<16x128xf32> to vector<16x128xbf16>
    %cst_11 = arith.constant dense<0.000000e+00> : vector<16x128xf32>
    %17 = tpu.matmul %16, %0, %cst_11 {dimension_numbers = #tpu.dot_dimension_numbers<[1], [0], [0], [1], [0, 0, 1, 1], [], []>} : vector<16x128xbf16>, vector<128x128xbf16>, vector<16x128xf32> -> vector<16x128xf32>
    %18 = vector.broadcast %1 : vector<1x128xf32> to vector<16x128xf32>
    %19 = arith.addf %17, %18 : vector<16x128xf32>
    %cst_12 = arith.constant 5.000000e-01 : f32
    %20 = vector.broadcast %cst_12 : f32 to vector<16x128xf32>
    %21 = arith.mulf %20, %19 : vector<16x128xf32>
    %cst_13 = arith.constant 0.707106769 : f32
    %22 = vector.broadcast %cst_13 : f32 to vector<16x128xf32>
    %23 = arith.mulf %19, %22 : vector<16x128xf32>
    %24 = math.erf %23 : vector<16x128xf32>
    %cst_14 = arith.constant 1.000000e+00 : f32
    %25 = vector.broadcast %cst_14 : f32 to vector<16x128xf32>
    %26 = arith.addf %25, %24 : vector<16x128xf32>
    %27 = arith.mulf %21, %26 : vector<16x128xf32>
    %28 = vector.shape_cast %13 : vector<1x128xf32> to vector<1x1x128xf32>
    %29 = vector.shape_cast %28 : vector<1x1x128xf32> to vector<1x1x128xf32>
    %30 = vector.broadcast %29 : vector<1x1x128xf32> to vector<2x1x128xf32>
    %31 = vector.shape_cast %27 : vector<16x128xf32> to vector<2x8x128xf32>
    %32 = tpu.concatenate %30, %31 in 1 : vector<2x1x128xf32>, vector<2x8x128xf32> -> vector<2x9x128xf32>
    %c0_15 = arith.constant 0 : index
    %c0_16 = arith.constant 0 : index
    %c0_17 = arith.constant 0 : index
    %33 = vector.load %arg5[%c0_15, %c0_16, %c0_17] : memref<2x9x128xf32, #tpu.memory_space<vmem>>, vector<2x9x128xf32>
    tpu.vector_store %arg5[%c0_15, %c0_16, %c0_17], %32 {strides = array<i32>} : memref<2x9x128xf32, #tpu.memory_space<vmem>>, vector<2x9x128xf32>,
    return
  }
  func.func @transform_0(%arg0: i32) -> (i32, i32, i32) {
    %c0_i32 = arith.constant 0 : i32
    %c0_i32_0 = arith.constant 0 : i32
    %c0_i32_1 = arith.constant 0 : i32
    return %arg0, %c0_i32, %c0_i32_0 : i32, i32, i32
  }
  func.func @transform_1(%arg0: i32) -> (i32, i32) {
    %c0_i32 = arith.constant 0 : i32
    %c0_i32_0 = arith.constant 0 : i32
    %c0_i32_1 = arith.constant 0 : i32
    return %c0_i32, %c0_i32_0 : i32, i32
  }
  func.func @transform_2(%arg0: i32) -> (i32, i32) {
    %c0_i32 = arith.constant 0 : i32
    %c0_i32_0 = arith.constant 0 : i32
    %c0_i32_1 = arith.constant 0 : i32
    return %c0_i32, %c0_i32_0 : i32, i32
  }
  func.func @transform_3(%arg0: i32) -> (i32, i32) {
    %c0_i32 = arith.constant 0 : i32
    %c0_i32_0 = arith.constant 0 : i32
    %c0_i32_1 = arith.constant 0 : i32
    return %c0_i32, %c0_i32_0 : i32, i32
  }
  func.func @transform_4(%arg0: i32) -> (i32, i32, i32) {
    %c0_i32 = arith.constant 0 : i32
    %c0_i32_0 = arith.constant 0 : i32
    %c0_i32_1 = arith.constant 0 : i32
    return %arg0, %c0_i32, %c0_i32_0 : i32, i32, i32
  }
}

</mosaic_0001>

<bundles_post_ra>
// kernel: tpu_custom_call.1
= control target key start
LH: loop header
LB: loop body
LE: loop exit
PB: predicated region body
PF: predicated region fallthrough
CT: control target
= control target key end

     0   :  { %9 = vsyncpa [#allocation3], 0  ;;  %s448_s0 = inlined_call_operand.hbm [shape: f32[2,8,128], index: 0, kind: input, shape index: {}]   ;;  %s449_s1 = inlined_call_operand.vmem [shape: f32[1,128], index: 1, kind: input, shape index: {}]   ;;  %s450_s2 = inlined_call_operand.hbm [shape: bf16[128,128], index: 2, kind: input, shape index: {}]   ;;  %s451_s3 = inlined_call_operand.vmem [shape: f32[1,128], index: 3, kind: input, shape index: {}]   ;;  %s452_s4 = inlined_call_operand.vmem [shape: f32[2,9,128], index: 4, kind: output, shape index: {}]  }
   0x1   :  { %10 = vsyncpa [#allocation5], 0  ;;  %s373_s15 = smov [#allocation2]   ;;  %s325_s19 = scalar_lea.hbm %s448_s0, 256 }
   0x2   :  { %s16_s16 = sshll.u32 %s373_s15, 4  ;;  %p326_p0 = scmp.ne.s32.totalorder %s448_s0, %s325_s19  ;;  %s17_s16 = int_to_ptr.vmem [resolvable:$true] %s16_s16 }
   0x3   :  { %p329_p1 = scmp.lt.u32.totalorder %s325_s19, %s448_s0 }
   0x5   :  { %p331_p2 = pnand %p329_p1, %p326_p0 }
   0x7   :  { %334 = shalt.err (!%p331_p2)
}
   0x8   :  { %s335_s24 = scalar_lea.vmem %s17_s16, 256  ;;  %p340_p4 = scmp.lt.s32.totalorder %s17_s16, %s17_s16 }
   0x9   :  { %p336_p3 = scmp.ne.s32.totalorder %s17_s16, %s335_s24  ;;  %p341_p5 = scmp.lt.s32.totalorder %s335_s24, %s335_s24 }
   0xb   :  { %p342_p6 = por %p341_p5, %p340_p4 }
   0xd   :  { %p343_p7 = pnand %p342_p6, %p336_p3 }
   0xf   :  { %346 = shalt.err (!%p343_p7)
}
  0x10   :  { %s374_s25 = smov 128   ;;  %s375_s26 = smov 8  }
  0x11   :  { %22 = dma.hbm_to_vmem [thread:$0]  %s448_s0, 256, %s17_s16, [#allocation3], %s374_s25, %s374_s25, %s375_s26  }
  0x12   :  { %s376_s29 = smov [#allocation4]   ;;  %s347_s7 = scalar_lea.hbm %s450_s2, 1024 }
  0x13   :  { %s30_s30 = sshll.u32 %s376_s29, 4  ;;  %p348_p8 = scmp.ne.s32.totalorder %s450_s2, %s347_s7  ;;  %s31_s30 = int_to_ptr.vmem [resolvable:$true] %s30_s30 }
  0x14   :  { %p351_p9 = scmp.lt.u32.totalorder %s347_s7, %s450_s2 }
  0x16   :  { %p353_p10 = pnand %p351_p9, %p348_p8 }
  0x18   :  { %356 = shalt.err (!%p353_p10)
}
  0x19   :  { %s357_s12 = scalar_lea.vmem %s31_s30, 1024  ;;  %p362_p12 = scmp.lt.s32.totalorder %s31_s30, %s31_s30 }
  0x1a   :  { %p358_p11 = scmp.ne.s32.totalorder %s31_s30, %s357_s12  ;;  %p363_p13 = scmp.lt.s32.totalorder %s357_s12, %s357_s12 }
  0x1c   :  { %p364_p0 = por %p363_p13, %p362_p12 }
  0x1e   :  { %p365_p1 = pnand %p364_p0, %p358_p11 }
  0x20   :  { %368 = shalt.err (!%p365_p1)
}
  0x21   :  { %s377_s0 = smov 64   ;;  %s378_s13 = smov 4  }
  0x22   :  { %36 = dma.hbm_to_vmem [thread:$0]  %s450_s2, 1024, %s31_s30, [#allocation5], %s377_s0, %s377_s0, %s378_s13  }
  0x23   :  { %369 = dma.done.wait [#allocation3], 256  }
  0x24   :  { %370 = vsyncadd [#allocation3], 4294967040 }
  0x25   :  { %371 = dma.done.wait [#allocation5], 1024  }
  0x26   :  { %372 = vsyncadd [#allocation5], 4294966272  ;;  %v379_v0 = vmov 0.0   ;;  %vm380_vm0 = vmmov 0   ;;  %v311_v1 = vld [vmem:[#allocation4] sm:$0xff]   ;;  %v312_v2 = vld [vmem:[#allocation4 + $0x8] sm:$0xff]   ;;  %v162_v14 = vlaneseq }
  0x27   :  { %263 = vmatprep.subr.bf16.mxu0 %v379_v0  ;;  %283 = vmatprep.subr.bf16.mxu1 %v379_v0  ;;  %v313_v3 = vld [vmem:[#allocation4 + $0x10] sm:$0xff]   ;;  %v314_v4 = vld [vmem:[#allocation4 + $0x18] sm:$0xff]   ;;  %v315_v5 = vld [vmem:[#allocation4 + $0x20] sm:$0xff]   ;;  %vm224_vm1 = vcmask 1040384  }
  0x28   :  { %279 = vmatprep.mubr.msk.bf16.mxu0 %vm380_vm0, %v379_v0  ;;  %299 = vmatprep.mubr.msk.bf16.mxu1 %vm380_vm0, %v379_v0  ;;  %v316_v6 = vld [vmem:[#allocation4 + $0x28] sm:$0xff]   ;;  %v317_v7 = vld [vmem:[#allocation4 + $0x30] sm:$0xff]   ;;  %v318_v8 = vld [vmem:[#allocation4 + $0x38] sm:$0xff]   ;;  %v163_v15 = vshrl.u32 %v162_v14, 7 }
  0x29   :  { %264 = vmatpush3.bf16.msra.mxu0 %v311_v1  ;;  %284 = vmatpush3.bf16.msra.mxu1 %v311_v1  ;;  %v63_v9 = vld [vmem:[%s449_s1] sm:$0x1]  ;;  %v159_v11 = vld [vmem:[#allocation2 + $0x8] sm:$0xff] }
  0x2a   :  { %265 = vmatprep.subr.bf16.mxu0 %v379_v0  ;;  %285 = vmatprep.subr.bf16.mxu1 %v379_v0  ;;  %v158_v10 = vld [vmem:[#allocation2] sm:$0xff]  ;;  %v64_v12 = vpack.c.bf16 %v63_v9, %v63_v9  ;;  %v164_v16 = vsub.s32 0, %v163_v15 }
  0x2b   :  { %v160_v13 = vpack.c.bf16 %v159_v11, %v158_v10  ;;  %v62_v17 = vld [vmem:[%s451_s3] sm:$0x1] }
  0x2c   :  { %v165_v18 = vrot.slane %v62_v17, %v164_v16 }
  0x2d   :  { %266 = vmatpush3.bf16.msra.mxu0 %v312_v2  ;;  %286 = vmatpush3.bf16.msra.mxu1 %v312_v2 }
  0x2e   :  { %267 = vmatprep.subr.bf16.mxu0 %v379_v0  ;;  %287 = vmatprep.subr.bf16.mxu1 %v379_v0 }
  0x31   :  { %268 = vmatpush3.bf16.msra.mxu0 %v313_v3  ;;  %288 = vmatpush3.bf16.msra.mxu1 %v313_v3 }
  0x32   :  { %269 = vmatprep.subr.bf16.mxu0 %v379_v0  ;;  %289 = vmatprep.subr.bf16.mxu1 %v379_v0 }
  0x35   :  { %270 = vmatpush3.bf16.msra.mxu0 %v314_v4  ;;  %290 = vmatpush3.bf16.msra.mxu1 %v314_v4 }
  0x36   :  { %271 = vmatprep.subr.bf16.mxu0 %v379_v0  ;;  %291 = vmatprep.subr.bf16.mxu1 %v379_v0 }
  0x39   :  { %272 = vmatpush3.bf16.msra.mxu0 %v315_v5  ;;  %292 = vmatpush3.bf16.msra.mxu1 %v315_v5 }
  0x3a   :  { %273 = vmatprep.subr.bf16.mxu0 %v379_v0  ;;  %293 = vmatprep.subr.bf16.mxu1 %v379_v0 }
  0x3d   :  { %274 = vmatpush3.bf16.msra.mxu0 %v316_v6  ;;  %294 = vmatpush3.bf16.msra.mxu1 %v316_v6 }
  0x3e   :  { %275 = vmatprep.subr.bf16.mxu0 %v379_v0  ;;  %295 = vmatprep.subr.bf16.mxu1 %v379_v0 }
  0x41   :  { %276 = vmatpush3.bf16.msra.mxu0 %v317_v7  ;;  %296 = vmatpush3.bf16.msra.mxu1 %v317_v7 }
  0x42   :  { %277 = vmatprep.subr.bf16.mxu0 %v379_v0  ;;  %297 = vmatprep.subr.bf16.mxu1 %v379_v0 }
  0x45   :  { %278 = vmatpush3.bf16.msra.mxu0 %v318_v8  ;;  %298 = vmatpush3.bf16.msra.mxu1 %v318_v8 }
  0x48   :  { %280 = vmatmul.mubr.bf16.vlgmr.msra.gmra.mrb[0].mxu0 %v64_v12  ;;  %300 = vmatmul.mubr.bf16.vlgmr.msra.gmra.mrb[0].mxu1 %v160_v13 }
 0x11b   :  { %v147_v19 = vpop.f32.mrb[0].mxu0  ;;  %v201_v20 = vpop.f32.mrb[0].mxu1 }
 0x11c   :  { %v148_v21 = vadd.f32 %v147_v19, %v62_v17  ;;  %v202_v22 = vadd.f32 %v201_v20, %v165_v18  ;;  %v301_v23 = vpop.f32.mrb[1].mxu1  ;;  %v281_v24 = vpop.f32.mrb[1].mxu0 }
 0x11d   :  { %v204_v25 = vpop.f32.mrb[2].mxu1  ;;  %v150_v26 = vpop.f32.mrb[2].mxu0 }
 0x11e   :  { %v154_v27 = vmul.f32 0.70710677, %v148_v21  ;;  %v210_v28 = vmul.f32 0.70710677, %v202_v22  ;;  %v205_v29 = vadd.f32 %v204_v25, %v165_v18  ;;  %v302_v30 = vpop.f32.mrb[3].mxu1  ;;  %v282_v31 = vpop.f32.mrb[3].mxu0 }
 0x11f   :  { %v208_v36 = vmul.f32 0.5, %v202_v22  ;;  %v153_v39 = vmul.f32 0.5, %v148_v21 }
 0x120   :  { %319 = verf.f32 %v154_v27  ;;  %v211_v32 = vmul.f32 0.70710677, %v205_v29  ;;  %v209_v41 = vmul.f32 0.5, %v205_v29 }
 0x121   :  { %321 = verf.f32 %v210_v28 }
 0x122   :  { %323 = verf.f32 %v211_v32 }
 0x12a   :  { %v320_v33 = vpop.eup %319 }
 0x12b   :  { %v322_v34 = vpop.eup %321  ;;  %v156_v35 = vadd.f32 1.0, %v320_v33 }
 0x12c   :  { %v214_v37 = vadd.f32 1.0, %v322_v34  ;;  %v324_v38 = vpop.eup %323 }
 0x12d   :  { %v215_v42 = vadd.f32 1.0, %v324_v38  ;;  %v157_v43 = vmul.f32 %v156_v35, %v153_v39 }
 0x12e   :  { %v216_v40 = vmul.f32 %v214_v37, %v208_v36 }
 0x12f   :  { %v217_v45 = vmul.f32 %v215_v42, %v209_v41 }
 0x130   :  { %v220_v44 = vrot.slane %v216_v40, 7 }
 0x131   :  { %v221_v47 = vrot.slane %v217_v45, 7 }
 0x132   :  { %v225_v46 = vsel %vm224_vm1, %v157_v43, %v220_v44  ;;  %228 = vst [vmem:[%s452_s4 + $0x8] sm:$0x1] %v220_v44 }
 0x133   :  { %227 = vst [vmem:[%s452_s4] sm:$0xff] %v225_v46  ;;  %v226_v48 = vsel %vm224_vm1, %v157_v43, %v221_v47  ;;  %230 = vst [vmem:[%s452_s4 + $0x18] sm:$0x1] %v221_v47 }
 0x134   :  { %229 = vst [vmem:[%s452_s4 + $0x10] sm:$0xff] %v226_v48 }
 0x135   :  { %235 = vsyncpa [#allocation3], 1 }
 0x136   :  { %236 = vsyncpa [#allocation5], 1 }

</bundles_post_ra>
